<compile_context>
chip_gen: v7x
topology: tpu7x:2x2x1
jax: 0.10.0
libtpu: 0.0.40
codegen_flags: <defaults>
</compile_context>

<pallas_src>
import jax
import jax.numpy as jnp
from jax.experimental import pallas as pl
from jax.experimental.pallas import tpu as pltpu


def _round_up(x, m):
    return (x + m - 1) // m * m


def _vmem_capacity_bytes():
    try:
        return int(pltpu.get_tpu_info().vmem_capacity_bytes)
    except Exception:
        return 64 << 20  # conservative default (v7x per-TC capacity)


def _largest_divisor_tile(total_pad, unit, max_units):
    """Largest multiple of `unit` dividing `total_pad`, capped at max_units*unit.

    Only used on the rare large-W fallback path; the hot resident-W path has no
    K/N tiling and therefore no divisibility constraint.
    """
    q = total_pad // unit
    best = 1
    for d in range(1, min(q, max_units) + 1):
        if q % d == 0:
            best = d
    return best * unit


# ----------------------------------------------------------------------------
# Kernels
# ----------------------------------------------------------------------------
def _resident_kernel(x_ref, w_ref, b_ref, o_ref):
    # x_ref: (tm, K_pad)  activations (native dtype, cast in-kernel)
    # w_ref: (K_pad, tn)  pre-transposed weight slab, VMEM-resident
    # b_ref: (1,  tn)     bias (f32)
    # o_ref: (tm, tn)     f32 output tile
    x = x_ref[...].astype(w_ref.dtype)
    o_ref[...] = (
        jnp.dot(x, w_ref[...], preferred_element_type=jnp.float32) + b_ref[...]
    ).astype(o_ref.dtype)


def _tiled_kernel(x_ref, w_ref, b_ref, o_ref):
    # Fallback: 3-D tiling, output ref is resident across the K axis
    # (its index_map ignores k) so we accumulate directly into it (f32) and
    # initialize it with the broadcast bias at k == 0.
    @pl.when(pl.program_id(2) == 0)
    def _():
        o_ref[...] = jnp.broadcast_to(b_ref[...], o_ref.shape)

    x = x_ref[...].astype(w_ref.dtype)
    o_ref[...] += jnp.dot(x, w_ref[...], preferred_element_type=jnp.float32)


# ----------------------------------------------------------------------------
# One-time parameter preparation (frozen probe: do NOT redo this per call)
# ----------------------------------------------------------------------------
def prepare_linear_classifier_params(weight, bias, *, use_bf16=True):
    """Pad, transpose and (optionally) cast the frozen probe parameters once.

    weight: (num_labels, dim) PyTorch nn.Linear layout
    bias  : (num_labels,)
    Returns (w_t_pad, b_pad, num_labels, dim) with
      w_t_pad: (K_pad, N_pad) weight, transposed, zero-padded, bf16 or f32
      b_pad  : (1, N_pad) f32 bias, zero-padded
    """
    num_labels, dim = weight.shape
    K_pad = _round_up(dim, 128)
    N_pad = _round_up(num_labels, 128)
    w_dtype = jnp.bfloat16 if use_bf16 else jnp.float32

    w_t = jnp.asarray(weight, jnp.float32).T.astype(w_dtype)          # (dim, num_labels)
    w_t_pad = jnp.zeros((K_pad, N_pad), w_dtype).at[:dim, :num_labels].set(w_t)
    b_pad = jnp.zeros((1, N_pad), jnp.float32).at[0, :num_labels].set(
        jnp.asarray(bias, jnp.float32))
    return w_t_pad, b_pad, num_labels, dim


# ----------------------------------------------------------------------------
# Forward
# ----------------------------------------------------------------------------
def linear_classifier_forward(x, w_t_pad, b_pad, num_labels, dim, *,
                              max_tm=512, max_tn=512, max_tk=2048):
    """Pallas forward for LinearClassifier using pre-prepared params.

    x       : (B, *) any trailing shape, flattened to (B, dim)
    w_t_pad : (K_pad, N_pad) from prepare_linear_classifier_params
    b_pad   : (1, N_pad)
    returns : (B, num_labels) float32
    """
    B = x.shape[0]
    x2 = x.reshape(B, -1)                     # x.view(B, -1)
    assert x2.shape[1] == dim
    K_pad, N_pad = w_t_pad.shape

    w_item = jnp.dtype(w_t_pad.dtype).itemsize
    x_item = jnp.dtype(x2.dtype).itemsize

    vmem_budget = int(_vmem_capacity_bytes() * 0.70)   # ~45 MiB v7x, ~90 MiB v5e/v6e

    # --- M tiling: pad-to-tile (no divisor search on the hot path) -----------
    tm = min(max_tm, _round_up(B, 8))
    B_pad = _round_up(B, tm)
    m_blocks = B_pad // tm

    # --- resident-W path ------------------------------------------------------
    # Split N in two only when M collapses to one block, so a v7x megacore still
    # gets >= 2 blocks on a parallel axis (irrelevant but harmless on v5e/v6e).
    n_blocks = 2 if (m_blocks == 1 and N_pad % 256 == 0) else 1
    tn_res = N_pad // n_blocks

    def _resident_est(tn_):
        return (2 * K_pad * tn_ * w_item        # W slab (double-buffered)
                + 2 * tm * K_pad * x_item       # x tiles
                + 2 * tm * tn_ * 4              # f32 output tiles
                + 2 * 8 * tn_ * 4)              # bias tiles (sublane-padded)

    use_resident = _resident_est(tn_res) <= vmem_budget

    # Pad x only if it is not already tile-aligned.
    if B_pad != B or K_pad != dim:
        xp = jnp.zeros((B_pad, K_pad), x2.dtype).at[:B, :dim].set(x2)
    else:
        xp = x2

    if use_resident:
        tn = tn_res
        est = _resident_est(tn)
        vmem_limit = min(max(int(1.5 * est) + (2 << 20), 32 << 20), vmem_budget)
        # Grid: N outermost (W re-DMA'd only n_blocks times), M innermost.
        out = pl.pallas_call(
            _resident_kernel,
            out_shape=jax.ShapeDtypeStruct((B_pad, N_pad), jnp.float32),
            grid_spec=pltpu.PrefetchScalarGridSpec(
                num_scalar_prefetch=0,
                grid=(n_blocks, m_blocks),
                in_specs=[
                    pl.BlockSpec((tm, K_pad), lambda j, i: (i, 0)),   # x row block
                    pl.BlockSpec((K_pad, tn), lambda j, i: (0, j)),   # resident W
                    pl.BlockSpec((1, tn), lambda j, i: (0, j)),       # bias
                ],
                out_specs=pl.BlockSpec((tm, tn), lambda j, i: (i, j)),
            ),
            compiler_params=pltpu.CompilerParams(
                dimension_semantics=("parallel", "parallel"),
                vmem_limit_bytes=vmem_limit,
            ),
        )(xp, w_t_pad, b_pad)
    else:
        # Fallback for very large dim * num_labels: 3-D tiling, K-resident
        # f32 output accumulator (no scratch), bias fused at k == 0.
        tn = _largest_divisor_tile(N_pad, 128, max_tn // 128)
        tk = _largest_divisor_tile(K_pad, 128, max_tk // 128)
        est = (2 * tm * tk * x_item + 2 * tk * tn * w_item
               + 2 * 8 * tn * 4 + 2 * tm * tn * 4)
        vmem_limit = min(max(int(1.5 * est) + (2 << 20), 32 << 20), vmem_budget)
        grid = (m_blocks, N_pad // tn, K_pad // tk)
        out = pl.pallas_call(
            _tiled_kernel,
            out_shape=jax.ShapeDtypeStruct((B_pad, N_pad), jnp.float32),
            grid_spec=pltpu.PrefetchScalarGridSpec(
                num_scalar_prefetch=0,
                grid=grid,
                in_specs=[
                    pl.BlockSpec((tm, tk), lambda i, j, k: (i, k)),
                    pl.BlockSpec((tk, tn), lambda i, j, k: (k, j)),
                    pl.BlockSpec((1, tn), lambda i, j, k: (0, j)),
                ],
                out_specs=pl.BlockSpec((tm, tn), lambda i, j, k: (i, j)),
            ),
            compiler_params=pltpu.CompilerParams(
                dimension_semantics=("parallel", "parallel", "arbitrary"),
                vmem_limit_bytes=vmem_limit,
            ),
        )(xp, w_t_pad, b_pad)

    return out[:B, :num_labels]


def init_params(key, dim, num_labels):
    """Deterministic init matching the module: weight ~ N(0, 0.01), bias = 0."""
    w = 0.01 * jax.random.normal(key, (num_labels, dim), dtype=jnp.float32)
    b = jnp.zeros((num_labels,), dtype=jnp.float32)
    return w, b


if __name__ == "__main__":
    key = jax.random.PRNGKey(0)
    k_x, k_w, k_b = jax.random.split(key, 3)

    # Small frozen-feature map; B=6 (not a multiple of 8) and num_labels=250
    # (not a multiple of 128) deliberately exercise padding and the N-split
    # (m_blocks == 1) megacore path.
    B, C, H, W = 6, 4, 4, 8
    dim = C * H * W            # 128
    num_labels = 250

    x = jax.random.normal(k_x, (B, C, H, W), dtype=jnp.float32)
    weight, bias = init_params(k_w, dim, num_labels)
    # Non-zero bias so the fused bias path is actually checked.
    bias = bias + 0.01 * jax.random.normal(k_b, (num_labels,), dtype=jnp.float32)

    # Reference in plain JAX (same semantics as nn.Linear forward).
    y_ref = x.reshape(B, -1) @ weight.T + bias

    # f32 weights (parity path). Param prep happens ONCE, outside the forward.
    w32, b32, nl, d = prepare_linear_classifier_params(weight, bias, use_bf16=False)
    y = linear_classifier_forward(x, w32, b32, nl, d)
    jax.block_until_ready(y)
    assert y.shape == (B, num_labels)
    assert jnp.allclose(y, y_ref, atol=1e-3, rtol=1e-3), "f32 mismatch vs reference"

    # bf16 weight stream (recommended hot path), f32 accumulation in-kernel.
    w16, b16, nl, d = prepare_linear_classifier_params(weight, bias, use_bf16=True)
    y16 = linear_classifier_forward(x, w16, b16, nl, d)
    jax.block_until_ready(y16)
    assert jnp.allclose(y16, y_ref, atol=3e-2, rtol=3e-2), "bf16 mismatch vs reference"

    print("KERNEL_OK")
</pallas_src>

<mosaic_0001>
module attributes {stable_mosaic.version = 11 : i64} {
  func.func @_resident_kernel(%arg0: i32, %arg1: i32, %arg2: memref<8x128xf32, #tpu.memory_space<vmem>>, %arg3: memref<128x128xf32, #tpu.memory_space<vmem>>, %arg4: memref<1x128xf32, #tpu.memory_space<vmem>>, %arg5: memref<8x128xf32, #tpu.memory_space<vmem>>) attributes {dimension_semantics = [#tpu.dimension_semantics<parallel>, #tpu.dimension_semantics<parallel>], iteration_bounds = array<i64: 2, 1>, scalar_prefetch = 0 : i64, scratch_operands = 0 : i64, tpu.core_type = #tpu.core_type<tc>, window_params = [{transform_indices = @transform_0, window_bounds = array<i64: 8, 128>}, {transform_indices = @transform_1, window_bounds = array<i64: 128, 128>}, {transform_indices = @transform_2, window_bounds = array<i64: 1, 128>}, {transform_indices = @transform_3, window_bounds = array<i64: 8, 128>}]} {
    %c0 = arith.constant 0 : index
    %c0_0 = arith.constant 0 : index
    %0 = vector.load %arg2[%c0, %c0_0] : memref<8x128xf32, #tpu.memory_space<vmem>>, vector<8x128xf32>
    %c0_1 = arith.constant 0 : index
    %c0_2 = arith.constant 0 : index
    %1 = vector.load %arg3[%c0_1, %c0_2] : memref<128x128xf32, #tpu.memory_space<vmem>>, vector<128x128xf32>
    %cst = arith.constant dense<0.000000e+00> : vector<8x128xf32>
    %2 = tpu.matmul %0, %1, %cst {dimension_numbers = #tpu.dot_dimension_numbers<[1], [0], [0], [1], [0, 0, 1, 1], [], []>} : vector<8x128xf32>, vector<128x128xf32>, vector<8x128xf32> -> vector<8x128xf32>
    %c0_3 = arith.constant 0 : index
    %c0_4 = arith.constant 0 : index
    %3 = vector.load %arg4[%c0_3, %c0_4] : memref<1x128xf32, #tpu.memory_space<vmem>>, vector<1x128xf32>
    %4 = vector.broadcast %3 : vector<1x128xf32> to vector<8x128xf32>
    %5 = arith.addf %2, %4 : vector<8x128xf32>
    %c0_5 = arith.constant 0 : index
    %c0_6 = arith.constant 0 : index
    %6 = vector.load %arg5[%c0_5, %c0_6] : memref<8x128xf32, #tpu.memory_space<vmem>>, vector<8x128xf32>
    tpu.vector_store %arg5[%c0_5, %c0_6], %5 {strides = array<i32>} : memref<8x128xf32, #tpu.memory_space<vmem>>, vector<8x128xf32>,
    return
  }
  func.func @transform_0(%arg0: i32, %arg1: i32) -> (i32, i32) {
    %c0_i32 = arith.constant 0 : i32
    %c0_i32_0 = arith.constant 0 : i32
    return %arg1, %c0_i32 : i32, i32
  }
  func.func @transform_1(%arg0: i32, %arg1: i32) -> (i32, i32) {
    %c0_i32 = arith.constant 0 : i32
    %c0_i32_0 = arith.constant 0 : i32
    return %c0_i32, %arg0 : i32, i32
  }
  func.func @transform_2(%arg0: i32, %arg1: i32) -> (i32, i32) {
    %c0_i32 = arith.constant 0 : i32
    %c0_i32_0 = arith.constant 0 : i32
    return %c0_i32, %arg0 : i32, i32
  }
  func.func @transform_3(%arg0: i32, %arg1: i32) -> (i32, i32) {
    %c0_i32 = arith.constant 0 : i32
    return %arg1, %arg0 : i32, i32
  }
}

</mosaic_0001>

<bundles_post_ra>
// kernel: tpu_custom_call.1
= control target key start
LH: loop header
LB: loop body
LE: loop exit
PB: predicated region body
PF: predicated region fallthrough
CT: control target
= control target key end

     0   :  { %8 = vsyncpa [#allocation3], 0  ;;  %s1039_s0 = inlined_call_operand.hbm [shape: f32[8,128], index: 0, kind: input, shape index: {}]   ;;  %s1040_s1 = inlined_call_operand.hbm [shape: f32[128,256], index: 1, kind: input, shape index: {}]   ;;  %s1041_s2 = inlined_call_operand.vmem [shape: f32[1,256], index: 2, kind: input, shape index: {}]   ;;  %s1042_s3 = inlined_call_operand.hbm [shape: f32[8,256], index: 3, kind: output, shape index: {}]  }
   0x1   :  { %9 = vsyncpa [#allocation6], 0 }
   0x2   :  { %11 = vsyncpa [#allocation6 + $0x1], 0 }
   0x3   :  { %12 = vsyncpa [#allocation4], 0 }
   0x4   :  { %14 = vsyncpa [#allocation4 + $0x1], 0  ;;  %s796_s12 = smov 0   ;;  %s798_s13 = smov 0  }
   0x5   :  { %s800_s14 = smov 0   ;;  %s802_s15 = smov 0  }
   0x6   :  { %s804_s16 = smov 0   ;;  %s806_s17 = smov 0  }
   0x7 LB: > { %s450_s18 = sadd.s32 4294967295, %s765_s17   ;;  %s451_s19 = sadd.s32 4294967294, %s765_s17   ;;  %s765_s17 = sphi %s806_s17, %s20_s17   ;;  %s761_s16 = sphi %s804_s16, %s1070_s16   ;;  %s757_s15 = sphi %s802_s15, %s1069_s15   ;;  %s753_s14 = sphi %s800_s14, %s1068_s14   ;;  %s749_s13 = sphi %s798_s13, %s1067_s13   ;;  %s745_s12 = sphi %s796_s12, %s1066_s12  }
   0x8   : > { %s65_s20 = sadd.s32 1, %s753_s14  ;;  %p72_p0 = scmp.ne.s32.totalorder %s753_s14, %s749_s13 }
   0x9   : > { %p73_p1 = scmp.eq.s32.totalorder %s765_s17, 0  ;;  %p78_p2 = scmp.ne.s32.totalorder %s749_s13, %s745_s12 }
   0xa   : > { %p834_p3 = scmp.eq.s32.totalorder %s450_s18, 0  ;;  %p130_p4 = scmp.eq.s32.totalorder %s450_s18, 1 }
   0xb   : > { %p838_p5 = por %p73_p1, %p72_p0  ;;  %p136_p6 = scmp.eq.s32.totalorder %s451_s19, 1 }
   0xc   : > { %s1049_s21 = scalar_select %p834_p3, 1, 0 }
   0xd   : > { %p844_p7 = por %p834_p3, %p78_p2  ;;  %p848_p8 = por %p130_p4, %p72_p0 }
   0xe   : > { %p852_p9 = por %p136_p6, %p78_p2  ;;  %p452_p10 = scmp.ge.s32.totalorder %s765_s17, 1 }
   0xf   : > { %s1051_s23 = scalar_select %p844_p7, 1, 0 }
  0x10   : > { %s1052_s24 = scalar_select %p848_p8, 1, 0 }
  0x11   : > { %s1053_s25 = scalar_select %p852_p9, 1, 0 }
  0x12   : > { %p143_p11 = scmp.lt.s32.totalorder %s765_s17, 3  ;;  %s767_s27 = smov [#allocation2]  }
  0x13   : > { %s158_s28 = sshll.u32 %s767_s27, 4  ;;  %p563_p1 = scmp.lt.s32.totalorder %s765_s17, 2  ;;  %s159_s28 = int_to_ptr.vmem [resolvable:$true] %s158_s28 }
  0x14   : > { %p859_p13 = pnand %p452_p10, %p143_p11  ;;  %s32_s4 = sadd.s32 1, %s761_s16 }
  0x15   : > { %p868_p4 = pnand %p563_p1, %p838_p5  ;;  %p879_p6 = scmp.ge.s32.totalorder %s32_s4, 2 }
  0x16   : > { %s1054_s26 = scalar_select %p859_p13, 1, 0 }
  0x17   : > { %p550_p0 = pneg %p859_p13  ;;  %s169_s6 = sand.u32 1, %s753_s14  }
  0x18   : > { %s1055_s29 = scalar_select %p868_p4, 1, 0 }
  0x19   : > { %p874_p2 = pnand %p550_p0, %p834_p3  ;;  %s621_s9 = scalar_lea.hbm %s1039_s0, 128 }
  0x1a   : > { %s1057_s5 = scalar_select %p879_p6, 1, 0 }
  0x1b   : > { %p622_p5 = scmp.ne.s32.totalorder %s1039_s0, %s621_s9  ;;  %p623_p10 = pneg %p874_p2 }
  0x1c   : > { %p628_p0 = scmp.lt.u32.totalorder %s621_s9, %s1039_s0 }
  0x1d   : > { %p624_p11 = pnand %p623_p10, %p622_p5 }
  0x1f   : > { %p625_p1 = pneg %p624_p11 }
  0x21   : > { %p630_p12 = pnand %p628_p0, %p625_p1 }
  0x23   : > { %633 = shalt.err (!%p630_p12)
}
  0x24   : > { %s634_s22 = scalar_lea.vmem %s159_s28, 128  ;;  %p642_p3 = scmp.lt.s32.totalorder %s159_s28, %s159_s28 }
  0x25   : > { %p635_p9 = scmp.ne.s32.totalorder %s159_s28, %s634_s22  ;;  %p643_p13 = scmp.lt.s32.totalorder %s634_s22, %s634_s22 }
  0x27   : > { %p637_p8 = pnand %p635_p9, %p623_p10  ;;  %p644_p4 = por %p643_p13, %p642_p3 }
  0x29   : > { %p638_p7 = pneg %p637_p8 }
  0x2b   : > { %p645_p6 = pnand %p644_p4, %p638_p7 }
  0x2d   : > { %648 = shalt.err (!%p645_p6)
}
  0x2e   : > { %553 = dma.hbm_to_vmem [thread:$0]  (!%p874_p2), %s1039_s0, 128, %s159_s28, [#allocation3]  }
  0x2f   : > { %p1058_p9 = scmp.ne.s32.totalorder %s1057_s5, 0  ;;  %s455_s8 = sshll.u32 %s169_s6, 7 }
  0x30   : > { %s456_s10 = sshll.u32 %s761_s16, 7  ;;  %s173_s19 = scalar_lea.vmem [#allocation5], %s455_s8 }
  0x31   : > { %s1072_s4 = smov (%p1058_p9, %s32_s4), 0  ;;  %s910_s18 = scalar_lea.hbm %s1040_s1, %s456_s10 }
  0x32   : > { %s62_s9 = ssub.s32 %s761_s16, %s1072_s4  ;;  %s179_s22 = sshll.u32 %s173_s19, 4  ;;  %s917_s22 = int_to_ptr.vmem [resolvable:$true] %s179_s22 }
  0x33   : > { %p63_p3 = scmp.eq.s32.totalorder %s62_s9, 0  ;;  %s919_s5 = scalar_lea.sflag [#allocation6], %s169_s6 }
  0x34   : > { %s649_s27 = scalar_lea.hbm %s910_s18, 2048  ;;  %p1059_p8 = scmp.ne.s32.totalorder %s1055_s29, 0 }
  0x35   : > { %s915_s28 = scalar_select %p63_p3, %s753_s14, %s65_s20  }
  0x36   : > { %p650_p7 = scmp.ne.s32.totalorder %s910_s18, %s649_s27  ;;  %p651_p12 = pneg %p1059_p8 }
  0x37   : > { %s654_s8 = scalar_lea.hbm %s1040_s1, 4096  ;;  %p655_p2 = scmp.lt.u32.totalorder %s910_s18, %s1040_s1 }
  0x38   : > { %p652_p13 = pnand %p651_p12, %p650_p7  ;;  %p656_p6 = scmp.lt.u32.totalorder %s654_s8, %s649_s27 }
  0x39   : > { %p658_p10 = scmp.lt.u32.totalorder %s649_s27, %s910_s18 }
  0x3a   : > { %p653_p4 = pneg %p652_p13  ;;  %p657_p5 = por %p656_p6, %p655_p2 }
  0x3c   : > { %p659_p11 = por %p658_p10, %p657_p5 }
  0x3e   : > { %p660_p1 = pnand %p659_p11, %p653_p4 }
  0x40   : > { %663 = shalt.err (!%p660_p1)
}
  0x41   : > { %s664_s20 = scalar_lea.vmem %s917_s22, 2048  ;;  %s768_s6 = smov [#allocation5]  }
  0x42   : > { %p665_p0 = scmp.ne.s32.totalorder %s917_s22, %s664_s20  ;;  %s669_s11 = sshll.u32 %s768_s6, 4  ;;  %s670_s11 = int_to_ptr.vmem [resolvable:$false] %s669_s11 }
  0x43   : > { %s671_s19 = scalar_lea.vmem %s670_s11, 4096  ;;  %p672_p7 = scmp.lt.s32.totalorder %s917_s22, %s670_s11 }
  0x44   : > { %p667_p9 = pnand %p665_p0, %p651_p12  ;;  %p673_p13 = scmp.lt.s32.totalorder %s671_s19, %s664_s20 }
  0x46   : > { %p668_p3 = pneg %p667_p9  ;;  %p674_p2 = por %p673_p13, %p672_p7 }
  0x48   : > { %p675_p6 = pnand %p674_p2, %p668_p3 }
  0x4a   : > { %678 = shalt.err (!%p675_p6)
}
  0x4b   : > { %s769_s27 = smov 256   ;;  %s770_s7 = smov 128  }
  0x4c   : > { %s771_s9 = smov 8   ;;  %p1060_p12 = scmp.ne.s32.totalorder %s1054_s26, 0 }
  0x4d   : > { %557 = dma.hbm_to_vmem [thread:$0]  (!%p1059_p8), %s910_s18, 2048, %s917_s22, %s919_s5, %s769_s27, %s770_s7, %s771_s9  }
  0x4e   : > { %197 = sbr.rel (%p1060_p12) target bundleno = 352 (0x160), region = 32  ;;  %p1061_p4 = scmp.ne.s32.totalorder (!%p1060_p12), %s1049_s21, 0 }
  0x55   : > { %732 = dma.done.wait (%p1061_p4), [#allocation3], 128  }
  0x56   : > { %734 = vsyncadd (%p1061_p4), [#allocation3], 4294967168  ;;  %s954_s8 = sand.u32 1, %s749_s13   ;;  %p1062_p8 = scmp.ne.s32.totalorder %s1051_s23, 0 }
  0x57   : > { %s459_s10 = sshll.u32 %s954_s8, 7  ;;  %s204_s30 = scalar_lea.sflag [#allocation6], %s954_s8 }
  0x58   : > { %s958_s20 = scalar_lea.vmem [#allocation5], %s459_s10 }
  0x59   : > { %736 = dma.done.wait (%p1062_p8), %s204_s30, 2048  }
  0x5a   : > { %738 = vsyncadd (%p1062_p8), %s204_s30, 4294965248  ;;  %v772_v0 = vmov 0.0|0.0   ;;  %vm773_vm0 = vmmov 0   ;;  %v774_v1 = vmov 0.0   ;;  %v237_v2 = vld [vmem:[%s958_s20] sm:$0xff]  ;;  %v238_v3 = vld [vmem:[%s958_s20 + $0x8] sm:$0xff] }
  0x5b   : > { %518 = vmatprep.subr.bf16.mxu0 %v772_v0  ;;  %515 = vmatprep.mubr.msk.f32.mxu0 %vm773_vm0, %v774_v1  ;;  %v239_v4 = vld [vmem:[%s958_s20 + $0x10] sm:$0xff]  ;;  %v519_v5 = vpack.c.bf16 %v238_v3, %v237_v2  ;;  %v240_v6 = vld [vmem:[%s958_s20 + $0x18] sm:$0xff]  ;;  %v241_v8 = vld [vmem:[%s958_s20 + $0x20] sm:$0xff]  ;;  %p233_p5 = scmp.lt.s32.totalorder %s757_s15, 1  ;;  %s460_s23 = sshll.u32 %s954_s8, 3 }
  0x5c   : > { %v522_v7 = vpack.c.bf16 %v240_v6, %v239_v4  ;;  %v242_v9 = vld [vmem:[%s958_s20 + $0x28] sm:$0xff]  ;;  %v243_v11 = vld [vmem:[%s958_s20 + $0x30] sm:$0xff]  ;;  %v244_v12 = vld [vmem:[%s958_s20 + $0x38] sm:$0xff]  ;;  %s463_s22 = sshll.u32 %s757_s15, 7  ;;  %s232_s5 = scalar_lea.vmem [#allocation7], %s460_s23 }
  0x5d   : > { %520 = vmatpush3.bf16.msra.mxu0 %v519_v5  ;;  %v525_v10 = vpack.c.bf16 %v242_v9, %v241_v8  ;;  %v528_v13 = vpack.c.bf16 %v244_v12, %v243_v11  ;;  %v245_v14 = vld [vmem:[%s958_s20 + $0x40] sm:$0xff]  ;;  %v246_v15 = vld [vmem:[%s958_s20 + $0x48] sm:$0xff]  ;;  %v247_v17 = vld [vmem:[%s958_s20 + $0x50] sm:$0xff]  ;;  %s234_s21 = scalar_select %p233_p5, %s757_s15, 1 }
  0x5e   : > { %521 = vmatprep.subr.bf16.mxu0 %v772_v0  ;;  %v531_v16 = vpack.c.bf16 %v246_v15, %v245_v14  ;;  %v248_v18 = vld [vmem:[%s958_s20 + $0x58] sm:$0xff]  ;;  %v249_v20 = vld [vmem:[%s958_s20 + $0x60] sm:$0xff]  ;;  %v250_v21 = vld [vmem:[%s958_s20 + $0x68] sm:$0xff]  ;;  %s347_s6 = sshll.u32 %s232_s5, 4  ;;  %s990_s27 = scalar_lea.hbm %s1042_s3, %s463_s22  ;;  %s992_s6 = int_to_ptr.vmem [resolvable:$true] %s347_s6 }
  0x5f   : > { %v534_v19 = vpack.c.bf16 %v248_v18, %v247_v17  ;;  %v537_v22 = vpack.c.bf16 %v250_v21, %v249_v20  ;;  %v251_v23 = vld [vmem:[%s958_s20 + $0x70] sm:$0xff]  ;;  %v252_v24 = vld [vmem:[%s958_s20 + $0x78] sm:$0xff]  ;;  %s235_s18 = scalar_lea.vmem %s1041_s2, %s234_s21  ;;  %s332_s7 = scalar_lea.sflag [#allocation4], %s954_s8 }
  0x60   : > { %v540_v25 = vpack.c.bf16 %v252_v24, %v251_v23  ;;  %v236_v26 = vld [vmem:[#allocation2] sm:$0xff]  ;;  %s679_s9 = scalar_lea.vmem %s992_s6, 128  ;;  %p1063_p11 = scmp.ne.s32.totalorder %s1052_s24, 0 }
  0x61   : > { %523 = vmatpush3.bf16.msra.mxu0 %v522_v7  ;;  %v461_v27 = vld [vmem:[%s235_s18] ss:$0 sm:$0xff]  ;;  %p680_p10 = scmp.ne.s32.totalorder %s992_s6, %s679_s9  ;;  %s775_s15 = smov [#allocation7]  }
  0x62   : > { %524 = vmatprep.subr.bf16.mxu0 %v772_v0  ;;  %s683_s10 = sshll.u32 %s775_s15, 4  ;;  %s684_s10 = int_to_ptr.vmem [resolvable:$false] %s683_s10 }
  0x63   : > { %p681_p1 = pnand %p680_p10, %p1063_p11  ;;  %s685_s30 = scalar_lea.vmem %s684_s10, 256 }
  0x64   : > { %p686_p9 = scmp.lt.s32.totalorder %s992_s6, %s684_s10  ;;  %p687_p3 = scmp.lt.s32.totalorder %s685_s30, %s679_s9 }
  0x65   : > { %526 = vmatpush3.bf16.msra.mxu0 %v525_v10  ;;  %p682_p0 = pneg %p681_p1 }
  0x66   : > { %527 = vmatprep.subr.bf16.mxu0 %v772_v0  ;;  %p688_p7 = por %p687_p3, %p686_p9 }
  0x68   : > { %p689_p13 = pnand %p688_p7, %p682_p0 }
  0x69   : > { %529 = vmatpush3.bf16.msra.mxu0 %v528_v13 }
  0x6a   : > { %530 = vmatprep.subr.bf16.mxu0 %v772_v0 }
  0x6d   : > { %532 = vmatpush3.bf16.msra.mxu0 %v531_v16 }
  0x6e   : > { %533 = vmatprep.subr.bf16.mxu0 %v772_v0 }
  0x71   : > { %535 = vmatpush3.bf16.msra.mxu0 %v534_v19 }
  0x72   : > { %536 = vmatprep.subr.bf16.mxu0 %v772_v0 }
  0x75   : > { %538 = vmatpush3.bf16.msra.mxu0 %v537_v22 }
  0x76   : > { %539 = vmatprep.subr.bf16.mxu0 %v772_v0 }
  0x79   : > { %541 = vmatpush3.bf16.msra.mxu0 %v540_v25 }
  0x7c   : > { %516 = vmatmul.mubr.f32.vlgmr.msra.gmra.mrb[0].mxu0 %v236_v26 }
 0x14f   : > { %v326_v28 = vpop.f32.mrb[0].mxu0 }
 0x150   : > { %v327_v29 = vadd.f32 %v461_v27, %v326_v28  ;;  %v517_v30 = vpop.f32.mrb[1].mxu0 }
 0x152   : > { %330 = vst [vmem:[%s232_s5] sm:$0xff] %v327_v29 }
 0x153   : > { %692 = shalt.err (!%p689_p13)
}
 0x154   : > { %s693_s8 = scalar_lea.hbm %s990_s27, 128  ;;  %s697_s23 = scalar_lea.hbm %s1042_s3, 256 }
 0x155   : > { %p694_p2 = scmp.ne.s32.totalorder %s990_s27, %s693_s8  ;;  %p698_p4 = scmp.lt.u32.totalorder %s990_s27, %s1042_s3 }
 0x156   : > { %p699_p8 = scmp.lt.u32.totalorder %s697_s23, %s693_s8  ;;  %p701_p10 = scmp.lt.u32.totalorder %s693_s8, %s990_s27 }
 0x157   : > { %p695_p6 = pnand %p694_p2, %p1063_p11 }
 0x158   : > { %p700_p5 = por %p699_p8, %p698_p4 }
 0x159   : > { %p696_p12 = pneg %p695_p6 }
 0x15a   : > { %p702_p1 = por %p701_p10, %p700_p5 }
 0x15c   : > { %p703_p0 = pnand %p702_p1, %p696_p12 }
 0x15e   : > { %706 = shalt.err (!%p703_p0)
}
 0x15f   : > { %548 = dma.vmem_to_hbm [thread:$0]  (%p1063_p11), %s992_s6, 128, %s990_s27, %s332_s7  }
 0x160 PF: > { %s359_s18 = sand.u32 1, %s745_s12   ;;  %p1064_p9 = scmp.ne.s32.totalorder %s1053_s25, 0 }
 0x161   : > { %p1065_p3 = scmp.ge.s32.totalorder %s765_s17, 2  ;;  %s360_s22 = scalar_lea.sflag [#allocation4], %s359_s18 }
 0x163   : > { %p559_p7 = pnand %p1065_p3, %p1064_p9 }
 0x165   : > { %740 = dma.done.wait (!%p559_p7), %s360_s22, 128  }
 0x166   : > { %742 = vsyncadd (!%p559_p7), %s360_s22, 4294967168  ;;  %s20_s17 = sadd.s32 1, %s765_s17   ;;  %s1066_s12 = smov %s749_s13 }
 0x167   : > { %p17_p13 = scmp.ge.s32.totalorder %s20_s17, 4   ;;  %s1067_s13 = smov %s753_s14 }
 0x168   : > { %s1068_s14 = smov %s915_s28  ;;  %s1069_s15 = smov %s761_s16 }
 0x169   : > { %s1070_s16 = smov %s1072_s4  ;;  %19 = sbr.rel (!%p17_p13) target bundleno = 7 (0x7), region = 86 }
 0x170   :  { %365 = vsyncpa [#allocation3], 1 }
 0x171   :  { %367 = vsyncpa [#allocation3 + $0x1], 1 }
 0x172   :  { %368 = vsyncpa [#allocation6], 1 }
 0x173   :  { %370 = vsyncpa [#allocation6 + $0x1], 1 }
 0x174   :  { %371 = vsyncpa [#allocation4], 1 }
 0x175   :  { %373 = vsyncpa [#allocation4 + $0x1], 1 }

</bundles_post_ra>
